<compile_context>
chip_gen: v7x
topology: tpu7x:2x2x1
jax: 0.10.0
libtpu: 0.0.40
codegen_flags: <defaults>
</compile_context>

<pallas_src>
import math

import jax
import jax.numpy as jnp
from jax.experimental import pallas as pl
from jax.experimental.pallas import tpu as pltpu


# --------------------------------------------------------------------------
# SelectItem.forward equivalent: pure indexing, no compute -> no kernel needed
# --------------------------------------------------------------------------
def select_item(inputs, item_index):
    return inputs[item_index]


# --------------------------------------------------------------------------
# Parameter construction (pure-JAX glue; mirrors PyTorch init_kernel exactly)
# --------------------------------------------------------------------------
def init_kernel(frame_len, frame_hop, num_fft=None, window="sqrt_hann"):
    if window != "sqrt_hann":
        raise RuntimeError("Now only support sqrt hanning window")
    fft_size = 2 ** math.ceil(math.log2(frame_len)) if not num_fft else num_fft
    n = jnp.arange(frame_len, dtype=jnp.float32)
    # torch.hann_window (periodic) ** 0.5
    win = jnp.sqrt(0.5 * (1.0 - jnp.cos(2.0 * jnp.pi * n / frame_len)))
    S_ = 0.5 * (fft_size * fft_size / frame_hop) ** 0.5
    w = jnp.fft.rfft(jnp.eye(fft_size, dtype=jnp.float32) / S_)   # (fft, F) complex
    kernel = jnp.stack([jnp.real(w), jnp.imag(w)], -1)            # (fft, F, 2)
    kernel = jnp.transpose(kernel, (2, 1, 0)) * win               # (2, F, fft) * (L,)
    kernel = kernel.reshape(fft_size + 2, 1, frame_len)           # (2F, 1, L)
    return kernel.astype(jnp.float32)


# --------------------------------------------------------------------------
# Pallas kernel: grid = (N,). One fused matmul + in-register overlap-add.
# --------------------------------------------------------------------------
def istft_pallas(m, p, K, frame_hop):
    """m, p: (N, F, T) float32 (PyTorch layout). K: (2F, 1, L). -> (N, 1, out_len)."""
    N, F, T = m.shape
    twoF, _, L = K.shape
    assert twoF == 2 * F
    out_len = (T - 1) * frame_hop + L
    out_len_pad = ((out_len + 127) // 128) * 128          # lane-dense output stores

    # glue: layout transpose + real/imag fusion (sin(p) == cos(p - pi/2))
    m_t = jnp.transpose(m, (0, 2, 1)).astype(jnp.float32)          # (N, T, F)
    p_t = jnp.transpose(p, (0, 2, 1)).astype(jnp.float32)          # (N, T, F)
    mag2 = jnp.concatenate([m_t, m_t], axis=-1)                    # (N, T, 2F)
    ph2 = jnp.concatenate([p_t, p_t - jnp.pi / 2.0], axis=-1)      # (N, T, 2F)
    # Fused synthesis weight [K_r; K_i] laid out lane-dense: zero-pad the frame
    # axis to out_len_pad so the matmul emits frame rows that only need a roll.
    k2 = jnp.zeros((twoF, out_len_pad), jnp.float32).at[:, :L].set(K[:, 0, :])

    def kernel(mag_ref, ph_ref, k_ref, out_ref):
        # [r | i] = mag * cos(phase-with-offset): one EUP pass, one MXU matmul.
        c = mag_ref[0] * jnp.cos(ph_ref[0])                        # (T, 2F)
        frames = jnp.dot(c, k_ref[...],
                         preferred_element_type=jnp.float32)       # (T, out_len_pad)
        # Overlap-add: frame t lives in lanes [0, L) of row t; shift it to
        # lanes [t*hop, t*hop+L) with a static XLU lane roll and accumulate.
        # TODO(synk): for long signals (large T) tile T / the output time axis
        # instead of a full static unroll.
        acc = frames[0:1, :]
        for t in range(1, T):
            acc = acc + pltpu.roll(frames[t:t + 1, :],
                                   shift=t * frame_hop, axis=1)
        out_ref[0] = acc                                           # single dense store

    out = pl.pallas_call(
        kernel,
        out_shape=jax.ShapeDtypeStruct((N, 1, out_len_pad), jnp.float32),
        grid=(N,),
        in_specs=[
            pl.BlockSpec((1, T, twoF), lambda n: (n, 0, 0)),
            pl.BlockSpec((1, T, twoF), lambda n: (n, 0, 0)),
            pl.BlockSpec((twoF, out_len_pad), lambda n: (0, 0)),
        ],
        out_specs=pl.BlockSpec((1, 1, out_len_pad), lambda n: (n, 0, 0)),
        compiler_params=pltpu.CompilerParams(
            dimension_semantics=("parallel",),
            vmem_limit_bytes=32 * 1024 * 1024),
    )(mag2, ph2, k2)
    return out[:, :, :out_len]


# --------------------------------------------------------------------------
# Pure-JAX reference (exact conv_transpose1d semantics) for verification
# --------------------------------------------------------------------------
def istft_ref(m, p, K, frame_hop):
    N, F, T = m.shape
    L = K.shape[2]
    out_len = (T - 1) * frame_hop + L
    r = m * jnp.cos(p)
    i = m * jnp.sin(p)
    c = jnp.concatenate([r, i], axis=1)          # (N, 2F, T)
    k_mat = K[:, 0, :]                           # (2F, L)
    out = jnp.zeros((N, 1, out_len), jnp.float32)
    for t in range(T):
        frame = c[:, :, t] @ k_mat               # (N, L)
        out = out.at[:, 0, t * frame_hop:t * frame_hop + L].add(frame)
    return out


if __name__ == "__main__":
    frame_len, frame_hop = 16, 8
    K = init_kernel(frame_len, frame_hop)        # (18, 1, 16), deterministic
    # TODO(synk): the PyTorch check_nan() runtime assert is omitted (trivial host-side check).
    F = K.shape[0] // 2                          # 9 frequency bins
    N, T = 2, 8                                  # batch, time frames

    key = jax.random.PRNGKey(0)
    km, kp = jax.random.split(key)
    m = jax.random.normal(km, (N, F, T), dtype=jnp.float32)   # magnitude
    p = jax.random.normal(kp, (N, F, T), dtype=jnp.float32)   # phase

    outputs = (istft_pallas(m, p, K, frame_hop),)
    out = select_item(outputs, 0)                # SelectItem(item_index=0).forward
    out = jax.block_until_ready(out)

    ref = istft_ref(m, p, K, frame_hop)
    assert out.shape == (N, 1, (T - 1) * frame_hop + frame_len)
    err = float(jnp.max(jnp.abs(out - ref)))
    if err < 1e-4:
        print("KERNEL_OK")
    else:
        raise SystemExit(f"mismatch: max abs err = {err}")
</pallas_src>

<mosaic_0001>
module attributes {stable_mosaic.version = 11 : i64} {
  func.func @kernel(%arg0: i32, %arg1: memref<1x8x18xf32, #tpu.memory_space<vmem>>, %arg2: memref<1x8x18xf32, #tpu.memory_space<vmem>>, %arg3: memref<18x128xf32, #tpu.memory_space<vmem>>, %arg4: memref<1x1x128xf32, #tpu.memory_space<vmem>>) attributes {dimension_semantics = [#tpu.dimension_semantics<parallel>], iteration_bounds = array<i64: 2>, scalar_prefetch = 0 : i64, scratch_operands = 0 : i64, tpu.core_type = #tpu.core_type<tc>, window_params = [{transform_indices = @transform_0, window_bounds = array<i64: 1, 8, 18>}, {transform_indices = @transform_1, window_bounds = array<i64: 1, 8, 18>}, {pipeline_mode = #tpu.pipeline_mode<synchronous>, transform_indices = @transform_2, window_bounds = array<i64: 18, 128>}, {transform_indices = @transform_3, window_bounds = array<i64: 1, 1, 128>}]} {
    %c0 = arith.constant 0 : index
    %c0_0 = arith.constant 0 : index
    %c0_1 = arith.constant 0 : index
    %0 = vector.load %arg1[%c0, %c0_0, %c0_1] : memref<1x8x18xf32, #tpu.memory_space<vmem>>, vector<1x8x18xf32>
    %1 = vector.shape_cast %0 : vector<1x8x18xf32> to vector<8x18xf32>
    %c0_2 = arith.constant 0 : index
    %c0_3 = arith.constant 0 : index
    %c0_4 = arith.constant 0 : index
    %2 = vector.load %arg2[%c0_2, %c0_3, %c0_4] : memref<1x8x18xf32, #tpu.memory_space<vmem>>, vector<1x8x18xf32>
    %3 = vector.shape_cast %2 : vector<1x8x18xf32> to vector<8x18xf32>
    %4 = math.cos %3 : vector<8x18xf32>
    %5 = arith.mulf %1, %4 : vector<8x18xf32>
    %c0_5 = arith.constant 0 : index
    %c0_6 = arith.constant 0 : index
    %6 = vector.load %arg3[%c0_5, %c0_6] : memref<18x128xf32, #tpu.memory_space<vmem>>, vector<18x128xf32>
    %cst = arith.constant dense<0.000000e+00> : vector<8x128xf32>
    %7 = tpu.matmul %5, %6, %cst {dimension_numbers = #tpu.dot_dimension_numbers<[1], [0], [0], [1], [0, 0, 1, 1], [], []>} : vector<8x18xf32>, vector<18x128xf32>, vector<8x128xf32> -> vector<8x128xf32>
    %8 = vector.extract_strided_slice %7 {offsets = [0, 0], sizes = [1, 128], strides = [1, 1]} : vector<8x128xf32> to vector<1x128xf32>
    %9 = vector.extract_strided_slice %7 {offsets = [1, 0], sizes = [1, 128], strides = [1, 1]} : vector<8x128xf32> to vector<1x128xf32>
    %c8_i32 = arith.constant 8 : i32
    %10 = tpu.dynamic_rotate %9 by %c8_i32 dim 1 : vector<1x128xf32>, i32 -> vector<1x128xf32>
    %11 = arith.addf %8, %10 : vector<1x128xf32>
    %12 = vector.extract_strided_slice %7 {offsets = [2, 0], sizes = [1, 128], strides = [1, 1]} : vector<8x128xf32> to vector<1x128xf32>
    %c16_i32 = arith.constant 16 : i32
    %13 = tpu.dynamic_rotate %12 by %c16_i32 dim 1 : vector<1x128xf32>, i32 -> vector<1x128xf32>
    %14 = arith.addf %11, %13 : vector<1x128xf32>
    %15 = vector.extract_strided_slice %7 {offsets = [3, 0], sizes = [1, 128], strides = [1, 1]} : vector<8x128xf32> to vector<1x128xf32>
    %c24_i32 = arith.constant 24 : i32
    %16 = tpu.dynamic_rotate %15 by %c24_i32 dim 1 : vector<1x128xf32>, i32 -> vector<1x128xf32>
    %17 = arith.addf %14, %16 : vector<1x128xf32>
    %18 = vector.extract_strided_slice %7 {offsets = [4, 0], sizes = [1, 128], strides = [1, 1]} : vector<8x128xf32> to vector<1x128xf32>
    %c32_i32 = arith.constant 32 : i32
    %19 = tpu.dynamic_rotate %18 by %c32_i32 dim 1 : vector<1x128xf32>, i32 -> vector<1x128xf32>
    %20 = arith.addf %17, %19 : vector<1x128xf32>
    %21 = vector.extract_strided_slice %7 {offsets = [5, 0], sizes = [1, 128], strides = [1, 1]} : vector<8x128xf32> to vector<1x128xf32>
    %c40_i32 = arith.constant 40 : i32
    %22 = tpu.dynamic_rotate %21 by %c40_i32 dim 1 : vector<1x128xf32>, i32 -> vector<1x128xf32>
    %23 = arith.addf %20, %22 : vector<1x128xf32>
    %24 = vector.extract_strided_slice %7 {offsets = [6, 0], sizes = [1, 128], strides = [1, 1]} : vector<8x128xf32> to vector<1x128xf32>
    %c48_i32 = arith.constant 48 : i32
    %25 = tpu.dynamic_rotate %24 by %c48_i32 dim 1 : vector<1x128xf32>, i32 -> vector<1x128xf32>
    %26 = arith.addf %23, %25 : vector<1x128xf32>
    %27 = vector.extract_strided_slice %7 {offsets = [7, 0], sizes = [1, 128], strides = [1, 1]} : vector<8x128xf32> to vector<1x128xf32>
    %c56_i32 = arith.constant 56 : i32
    %28 = tpu.dynamic_rotate %27 by %c56_i32 dim 1 : vector<1x128xf32>, i32 -> vector<1x128xf32>
    %29 = arith.addf %26, %28 : vector<1x128xf32>
    %c0_7 = arith.constant 0 : index
    %c0_8 = arith.constant 0 : index
    %c0_9 = arith.constant 0 : index
    %30 = vector.load %arg4[%c0_7, %c0_8, %c0_9] : memref<1x1x128xf32, #tpu.memory_space<vmem>>, vector<1x1x128xf32>
    %31 = vector.shape_cast %30 : vector<1x1x128xf32> to vector<1x128xf32>
    %32 = vector.shape_cast %29 : vector<1x128xf32> to vector<1x1x128xf32>
    tpu.vector_store %arg4[%c0_7, %c0_8, %c0_9], %32 {strides = array<i32>} : memref<1x1x128xf32, #tpu.memory_space<vmem>>, vector<1x1x128xf32>,
    return
  }
  func.func @transform_0(%arg0: i32) -> (i32, i32, i32) {
    %c0_i32 = arith.constant 0 : i32
    %c0_i32_0 = arith.constant 0 : i32
    %c0_i32_1 = arith.constant 0 : i32
    return %arg0, %c0_i32, %c0_i32_0 : i32, i32, i32
  }
  func.func @transform_1(%arg0: i32) -> (i32, i32, i32) {
    %c0_i32 = arith.constant 0 : i32
    %c0_i32_0 = arith.constant 0 : i32
    %c0_i32_1 = arith.constant 0 : i32
    return %arg0, %c0_i32, %c0_i32_0 : i32, i32, i32
  }
  func.func @transform_2(%arg0: i32) -> (i32, i32) {
    %c0_i32 = arith.constant 0 : i32
    %c0_i32_0 = arith.constant 0 : i32
    %c0_i32_1 = arith.constant 0 : i32
    return %c0_i32, %c0_i32_0 : i32, i32
  }
  func.func @transform_3(%arg0: i32) -> (i32, i32, i32) {
    %c0_i32 = arith.constant 0 : i32
    %c0_i32_0 = arith.constant 0 : i32
    %c0_i32_1 = arith.constant 0 : i32
    return %arg0, %c0_i32, %c0_i32_0 : i32, i32, i32
  }
}

</mosaic_0001>

<bundles_post_ra>
// kernel: tpu_custom_call.1
= control target key start
LH: loop header
LB: loop body
LE: loop exit
PB: predicated region body
PF: predicated region fallthrough
CT: control target
= control target key end

     0   :  { %8 = vsyncpa [#allocation3], 0  ;;  %s1157_s0 = inlined_call_operand.hbm [shape: f32[2,8,18], index: 0, kind: input, shape index: {}]   ;;  %s1158_s1 = inlined_call_operand.hbm [shape: f32[2,8,18], index: 1, kind: input, shape index: {}]   ;;  %s1159_s2 = inlined_call_operand.hbm [shape: f32[18,128], index: 2, kind: input, shape index: {}]   ;;  %s1160_s3 = inlined_call_operand.hbm [shape: f32[2,1,128], index: 3, kind: output, shape index: {}]  }
   0x1   :  { %10 = vsyncpa [#allocation3 + $0x1], 0 }
   0x2   :  { %11 = vsyncpa [#allocation6], 0 }
   0x3   :  { %13 = vsyncpa [#allocation6 + $0x1], 0 }
   0x4   :  { %14 = vsyncpa [#allocation4], 0 }
   0x5   :  { %16 = vsyncpa [#allocation4 + $0x1], 0  ;;  %s902_s12 = smov 0   ;;  %s904_s13 = smov 0  }
   0x6   :  { %s906_s14 = smov 0   ;;  %s908_s15 = smov 0  }
   0x7 LB: > { %s923_s16 = sadd.s32 4294967295, %s858_s15   ;;  %s571_s17 = sadd.s32 4294967294, %s858_s15   ;;  %s858_s15 = sphi %s908_s15, %s1182_s15   ;;  %s854_s14 = sphi %s906_s14, %s1181_s14   ;;  %s850_s13 = sphi %s904_s13, %s1180_s13   ;;  %s846_s12 = sphi %s902_s12, %s1179_s12  }
   0x8   : > { %p42_p0 = scmp.ne.s32.totalorder %s850_s13, %s846_s12  ;;  %p1161_p1 = scmp.eq.s32.totalorder %s923_s16, 0 }
   0x9   : > { %p119_p3 = scmp.eq.s32.totalorder %s571_s17, 1  ;;  %p572_p5 = scmp.ge.s32.totalorder %s858_s15, 1 }
   0xa   : > { %p932_p4 = por %p1161_p1, %p42_p0  ;;  %p126_p7 = scmp.lt.s32.totalorder %s858_s15, 3 }
   0xb   : > { %p937_p6 = por %p119_p3, %p42_p0  ;;  %s860_s21 = smov [#allocation7]  }
   0xc   : > { %s1165_s18 = scalar_select %p932_p4, 1, 0 }
   0xd   : > { %s1166_s19 = scalar_select %p937_p6, 1, 0 }
   0xe   : > { %p942_p8 = pnand %p572_p5, %p126_p7  ;;  %s138_s22 = sshll.u32 %s860_s21, 4  ;;  %s946_s22 = int_to_ptr.vmem [resolvable:$true] %s138_s22 }
   0xf   : > { %s958_s24 = sadd.s32 1, %s858_s15   ;;  %s29_s25 = sadd.s32 1, %s854_s14 }
  0x10   : > { %s1167_s20 = scalar_select %p942_p8, 1, 0 }
  0x11   : > { %p622_p9 = pneg %p942_p8  ;;  %s26_s26 = ssub.s32 %s858_s15, %s958_s24 }
  0x12   : > { %s696_s29 = scalar_lea.hbm %s1159_s2, 384 }
  0x13   : > { %p953_p11 = pnand %p622_p9, %p1161_p1  ;;  %p697_p12 = scmp.ne.s32.totalorder %s1159_s2, %s696_s29 }
  0x14   : > { %p703_p5 = scmp.lt.u32.totalorder %s696_s29, %s1159_s2 }
  0x15   : > { %p698_p13 = pneg %p953_p11 }
  0x17   : > { %p699_p0 = pnand %p698_p13, %p697_p12 }
  0x19   : > { %p700_p3 = pneg %p699_p0 }
  0x1b   : > { %p705_p7 = pnand %p703_p5, %p700_p3 }
  0x1d   : > { %708 = shalt.err (!%p705_p7)
}
  0x1e   : > { %s709_s7 = scalar_lea.vmem %s946_s22, 384  ;;  %p717_p2 = scmp.lt.s32.totalorder %s946_s22, %s946_s22 }
  0x1f   : > { %p710_p9 = scmp.ne.s32.totalorder %s946_s22, %s709_s7  ;;  %p718_p6 = scmp.lt.s32.totalorder %s709_s7, %s709_s7 }
  0x21   : > { %p712_p10 = pnand %p710_p9, %p698_p13  ;;  %p719_p4 = por %p718_p6, %p717_p2 }
  0x23   : > { %p713_p1 = pneg %p712_p10 }
  0x25   : > { %p720_p8 = pnand %p719_p4, %p713_p1 }
  0x27   : > { %723 = shalt.err (!%p720_p8)
}
  0x28   : > { %s861_s8 = smov 128   ;;  %s862_s9 = smov 8  }
  0x29   : > { %625 = dma.hbm_to_vmem [thread:$0]  (!%p953_p11), %s1159_s2, 384, %s946_s22, [#allocation6], %s861_s8, %s861_s8, %s862_s9  }
  0x2a   : > { %p27_p2 = scmp.eq.s32.totalorder %s26_s26, 0  ;;  %p36_p1 = scmp.ne.s32.totalorder %s854_s14, %s850_s13 }
  0x2b   : > { %p37_p4 = scmp.eq.s32.totalorder %s858_s15, 0  ;;  %p638_p6 = scmp.lt.s32.totalorder %s858_s15, 2 }
  0x2c   : > { %s989_s17 = scalar_select %p27_p2, %s854_s14, %s29_s25  }
  0x2d   : > { %p38_p8 = por %p37_p4, %p36_p1  ;;  %p1169_p10 = scmp.eq.s32.totalorder %s923_s16, 1 }
  0x2e   : > { %s152_s27 = sand.u32 1, %s854_s14   ;;  %s576_s28 = sshll.u32 %s858_s15, 7 }
  0x2f   : > { %p993_p12 = por %p1169_p10, %p36_p1  ;;  %s999_s29 = sshll.u32 %s152_s27, 3 }
  0x30   : > { %s1004_s22 = scalar_lea.hbm %s1157_s0, %s576_s28  ;;  %s156_s25 = scalar_lea.vmem [#allocation2], %s999_s29 }
  0x31   : > { %s1170_s21 = scalar_select %p993_p12, 1, 0 }
  0x32   : > { %s163_s26 = sshll.u32 %s156_s25, 4  ;;  %p1007_p11 = pnand %p638_p6, %p38_p8  ;;  %s1011_s26 = int_to_ptr.vmem [resolvable:$true] %s163_s26 }
  0x33   : > { %s1016_s7 = scalar_lea.hbm %s1158_s1, %s576_s28  ;;  %s153_s8 = scalar_lea.sflag [#allocation3], %s152_s27 }
  0x34   : > { %s724_s9 = scalar_lea.hbm %s1004_s22, 128  ;;  %p726_p0 = pneg %p1007_p11 }
  0x35   : > { %p725_p13 = scmp.ne.s32.totalorder %s1004_s22, %s724_s9  ;;  %s729_s23 = scalar_lea.hbm %s1157_s0, 256 }
  0x36   : > { %p730_p7 = scmp.lt.u32.totalorder %s1004_s22, %s1157_s0  ;;  %p731_p9 = scmp.lt.u32.totalorder %s729_s23, %s724_s9 }
  0x37   : > { %p727_p3 = pnand %p726_p0, %p725_p13  ;;  %p733_p1 = scmp.lt.u32.totalorder %s724_s9, %s1004_s22 }
  0x38   : > { %p732_p2 = por %p731_p9, %p730_p7 }
  0x39   : > { %p728_p5 = pneg %p727_p3 }
  0x3a   : > { %p734_p4 = por %p733_p1, %p732_p2 }
  0x3c   : > { %p735_p6 = pnand %p734_p4, %p728_p5 }
  0x3e   : > { %738 = shalt.err (!%p735_p6)
}
  0x3f   : > { %s739_s27 = scalar_lea.vmem %s1011_s26, 128  ;;  %s863_s28 = smov [#allocation2]  }
  0x40   : > { %p740_p8 = scmp.ne.s32.totalorder %s1011_s26, %s739_s27  ;;  %s744_s5 = sshll.u32 %s863_s28, 4  ;;  %s745_s5 = int_to_ptr.vmem [resolvable:$false] %s744_s5 }
  0x41   : > { %s746_s6 = scalar_lea.vmem %s745_s5, 256  ;;  %p747_p3 = scmp.lt.s32.totalorder %s1011_s26, %s745_s5 }
  0x42   : > { %p742_p10 = pnand %p740_p8, %p726_p0  ;;  %p748_p7 = scmp.lt.s32.totalorder %s746_s6, %s739_s27 }
  0x44   : > { %p743_p13 = pneg %p742_p10  ;;  %p749_p9 = por %p748_p7, %p747_p3 }
  0x46   : > { %p750_p2 = pnand %p749_p9, %p743_p13 }
  0x48   : > { %753 = shalt.err (!%p750_p2)
}
  0x49   : > { %629 = dma.hbm_to_vmem [thread:$0]  (!%p1007_p11), %s1004_s22, 128, %s1011_s26, %s153_s8  }
  0x4a   : > { %s170_s9 = sand.u32 1, %s858_s15   ;;  %s174_s10 = scalar_lea.vmem [#allocation5], %s999_s29 }
  0x4b   : > { %s181_s11 = sshll.u32 %s174_s10, 4  ;;  %s171_s23 = scalar_lea.sflag [#allocation6], %s170_s9  ;;  %s182_s11 = int_to_ptr.vmem [resolvable:$true] %s181_s11 }
  0x4c   : > { %s754_s30 = scalar_lea.hbm %s1016_s7, 128  ;;  %s759_s28 = scalar_lea.hbm %s1158_s1, 256 }
  0x4d   : > { %p755_p5 = scmp.ne.s32.totalorder %s1016_s7, %s754_s30  ;;  %p760_p6 = scmp.lt.u32.totalorder %s1016_s7, %s1158_s1 }
  0x4e   : > { %p761_p8 = scmp.lt.u32.totalorder %s759_s28, %s754_s30  ;;  %p763_p13 = scmp.lt.u32.totalorder %s754_s30, %s1016_s7 }
  0x4f   : > { %p757_p1 = pnand %p755_p5, %p726_p0 }
  0x50   : > { %p762_p10 = por %p761_p8, %p760_p6 }
  0x51   : > { %p758_p4 = pneg %p757_p1 }
  0x52   : > { %p764_p3 = por %p763_p13, %p762_p10 }
  0x54   : > { %p765_p7 = pnand %p764_p3, %p758_p4 }
  0x56   : > { %768 = shalt.err (!%p765_p7)
}
  0x57   : > { %s769_s29 = scalar_lea.vmem %s182_s11, 128  ;;  %s864_s22 = smov [#allocation5]  }
  0x58   : > { %p770_p9 = scmp.ne.s32.totalorder %s182_s11, %s769_s29  ;;  %s774_s26 = sshll.u32 %s864_s22, 4  ;;  %s775_s26 = int_to_ptr.vmem [resolvable:$false] %s774_s26 }
  0x59   : > { %s776_s8 = scalar_lea.vmem %s775_s26, 256  ;;  %p777_p1 = scmp.lt.s32.totalorder %s182_s11, %s775_s26 }
  0x5a   : > { %p772_p2 = pnand %p770_p9, %p726_p0  ;;  %p778_p12 = scmp.lt.s32.totalorder %s776_s8, %s769_s29 }
  0x5c   : > { %p773_p5 = pneg %p772_p2  ;;  %p779_p6 = por %p778_p12, %p777_p1 }
  0x5e   : > { %p780_p8 = pnand %p779_p6, %p773_p5 }
  0x60   : > { %783 = shalt.err (!%p780_p8)
}
  0x61   : > { %632 = dma.hbm_to_vmem [thread:$0]  (!%p1007_p11), %s1016_s7, 128, %s182_s11, %s171_s23  }
  0x62   : > { %p1172_p4 = scmp.ne.s32.totalorder %s1167_s20, 0 }
  0x63   : > { %s1067_s9 = sand.u32 (!%p1172_p4), 1, %s850_s13   ;;  %p1173_p12 = scmp.ne.s32.totalorder (!%p1172_p4), %s1165_s18, 0 }
  0x64   : > { %190 = sbr.rel (%p1172_p4) target bundleno = 556 (0x22c), region = 32  ;;  %s580_s10 = sshll.u32 (!%p1172_p4), %s1067_s9, 3 }
  0x65   : > { %s193_s30 = scalar_lea.sflag (!%p1172_p4), [#allocation3], %s1067_s9  ;;  %s1071_s25 = scalar_lea.vmem (!%p1172_p4), [#allocation2], %s580_s10 }
  0x6b   : > { %829 = dma.done.wait (%p1173_p12), %s193_s30, 128  }
  0x6c   : > { %831 = vsyncadd (%p1173_p12), %s193_s30, 4294967168  ;;  %s201_s4 = sand.u32 1, %s923_s16   ;;  %s205_s7 = scalar_lea.vmem [#allocation5], %s580_s10 }
  0x6d   : > { %s202_s20 = scalar_lea.sflag [#allocation6], %s201_s4 }
  0x6e   : > { %833 = dma.done.wait (%p1173_p12), %s202_s20, 128  }
  0x6f   : > { %835 = vsyncadd (%p1173_p12), %s202_s20, 4294967168  ;;  %p1174_p11 = scmp.eq.s32.totalorder %s923_s16, 0 }
  0x71   : > { %837 = dma.done.wait (%p1174_p11), [#allocation6], 384   ;;  %p1175_p0 = pmov %p1174_p11 }
  0x72   : > { %v865_v0 = vmov 0.0|0.0   ;;  %vm866_vm0 = vmmov 0   ;;  %v867_v1 = vmov 0.0   ;;  %v342_v2 = vld [vmem:[#allocation7] sm:$0xff]  ;;  %v343_v3 = vld [vmem:[#allocation7 + $0x8] sm:$0xff]  ;;  %v1086_v5 = vld [vmem:[%s205_s7] sm:$0xff] }
  0x73   : > { %839 = vsyncadd (%p1175_p0), [#allocation6], 4294966912  ;;  %605 = vmatprep.subr.bf16.mxu0 %v865_v0  ;;  %602 = vmatprep.mubr.msk.f32.mxu0 %vm866_vm0, %v867_v1  ;;  %v606_v4 = vpack.c.bf16 %v343_v3, %v342_v2  ;;  %v241_v6 = vand.u32 2139095040, %v1086_v5  ;;  %v344_v7 = vld [vmem:[#allocation7 + $0x10] sm:$0x3]  ;;  %vm349_vm1 = vcmask 1041408   ;;  %vm330_vm14 = vweird.f32 %v1086_v5 }
  0x74   : > { %v238_v9 = vand.u32 2147483647, %v1086_v5  ;;  %v868_v18 = vmov 683565275   ;;  %v869_v20 = vmov 2475754826  }
  0x75   : > { %607 = vmatpush3.bf16.msra.mxu0 %v606_v4  ;;  %v242_v8 = vshrl.u32 %v241_v6, 23  ;;  %v870_v22 = vmov 2131351028   ;;  %v871_v24 = vmov 2102212464   ;;  %vm240_vm9 = vcmp.lt.s32.totalorder %v1086_v5, 0 }
  0x76   : > { %600 = vmatprep.subr.mxu0 %v867_v1  ;;  %v245_v12 = vand.u32 8388607, %v238_v9  ;;  %v872_v26 = vmov 920167782   ;;  %v873_v33 = vmov 1326507024  }
  0x77   : > { %v583_v10 = vadd.s32 4294967169, %v242_v8  ;;  %vm239_vm10 = vcmp.le.f32.partialorder %v238_v9, 0.7853982  ;;  %vm345_vm15 = vcmask 146432   ;;  %s874_s18 = smov 24   ;;  %s875_s11 = smov 8  }
  0x78   : > { %v246_v15 = vor.u32 8388608, %v245_v12  ;;  %s876_s23 = smov 32   ;;  %s877_s27 = smov 16  }
  0x79   : > { %601 = vmatpush3.msk.msra.mxu0 %vm349_vm1, %v344_v7  ;;  %v248_v11 = vadd.s32 1, %v583_v10  ;;  %s878_s28 = smov 48   ;;  %s879_s5 = smov 40  }
  0x7a   : > { %v286_v35 = vshll.u32 %v246_v15, 8  ;;  %s880_s6 = smov 56   ;;  %s589_s29 = sshll.u32 %s923_s16, 4 }
  0x7b   : > { %vm249_vm2 = vcmp.gt.s32.totalorder %v248_v11, 0  ;;  %s235_s22 = scalar_lea.vmem [#allocation8], %s1067_s9  ;;  %s1113_s30 = scalar_lea.hbm %s1160_s3, %s589_s29 }
  0x7c   : > { %v250_v13 = vsel %vm249_vm2, %v248_v11, 0  ;;  %s473_s26 = sshll.u32 %s235_s22, 4  ;;  %p1176_p13 = scmp.ne.s32.totalorder %s1170_s21, 0  ;;  %s1115_s26 = int_to_ptr.vmem [resolvable:$true] %s473_s26 }
  0x7d   : > { %v252_v14 = vand.u32 31, %v250_v13  ;;  %v251_v16 = vshrl.u32 %v250_v13, 5  ;;  %s784_s4 = scalar_lea.vmem %s1115_s26, 16  ;;  %s881_s16 = smov [#allocation8]  }
  0x7e   : > { %p785_p10 = scmp.ne.s32.totalorder %s1115_s26, %s784_s4  ;;  %s788_s20 = sshll.u32 %s881_s16, 4  ;;  %s789_s20 = int_to_ptr.vmem [resolvable:$false] %s788_s20 }
  0x7f   : > { %v253_v17 = vsub.s32 32, %v252_v14  ;;  %v255_v19 = vshll.u32 %v868_v18, %v252_v14  ;;  %v258_v21 = vshll.u32 %v869_v20, %v252_v14  ;;  %v261_v23 = vshll.u32 %v870_v22, %v252_v14  ;;  %s790_s7 = scalar_lea.vmem %s789_s20, 32  ;;  %p791_p9 = scmp.lt.s32.totalorder %s1115_s26, %s789_s20 }
  0x80   : > { %v264_v25 = vshll.u32 %v871_v24, %v252_v14  ;;  %v267_v27 = vshll.u32 %v872_v26, %v252_v14  ;;  %vm270_vm3 = vcmp.lt.s32.totalorder %v251_v16, 1  ;;  %vm273_vm4 = vcmp.lt.s32.totalorder %v251_v16, 4  ;;  %p786_p3 = pnand %p785_p10, %p1176_p13  ;;  %p792_p2 = scmp.lt.s32.totalorder %s790_s7, %s784_s4 }
  0x81   : > { %v254_v28 = vshrl.u32 %v868_v18, %v253_v17  ;;  %v256_v29 = vshrl.u32 %v869_v20, %v253_v17  ;;  %v259_v30 = vshrl.u32 %v870_v22, %v253_v17  ;;  %v262_v31 = vshrl.u32 %v871_v24, %v253_v17 }
  0x82   : > { %v265_v32 = vshrl.u32 %v872_v26, %v253_v17  ;;  %v268_v34 = vshrl.u32 %v873_v33, %v253_v17  ;;  %vm271_vm5 = vcmp.lt.s32.totalorder %v251_v16, 2  ;;  %vm272_vm6 = vcmp.lt.s32.totalorder %v251_v16, 3  ;;  %p787_p7 = pneg %p786_p3  ;;  %p793_p5 = por %p792_p2, %p791_p9 }
  0x83   : > { %v257_v36 = vor.u32 %v256_v29, %v255_v19  ;;  %v260_v37 = vor.u32 %v259_v30, %v258_v21  ;;  %v263_v38 = vor.u32 %v262_v31, %v261_v23  ;;  %v236_v31 = vld [vmem:[%s1071_s25] sm:$0xff]  ;;  %s461_s25 = scalar_lea.sflag [#allocation4], %s1067_s9 }
  0x84   : > { %v266_v39 = vor.u32 %v265_v32, %v264_v25  ;;  %v269_v40 = vor.u32 %v268_v34, %v267_v27  ;;  %p794_p1 = pnand %p793_p5, %p787_p7 }
  0x85   : > { %v274_v41 = vsel %vm270_vm3, %v254_v28, %v257_v36  ;;  %v275_v42 = vsel %vm273_vm4, %v263_v38, 2102212464  ;;  %v278_v43 = vsel %vm270_vm3, %v257_v36, %v260_v37  ;;  %v282_v44 = vsel %vm270_vm3, %v260_v37, %v263_v38 }
  0x86   : > { %v276_v45 = vsel %vm272_vm6, %v260_v37, %v275_v42  ;;  %v279_v46 = vsel %vm273_vm4, %v266_v39, 920167782  ;;  %v283_v47 = vsel %vm273_vm4, %v269_v40, 1326507024 }
  0x87   : > { %v280_v48 = vsel %vm272_vm6, %v263_v38, %v279_v46  ;;  %v284_v49 = vsel %vm272_vm6, %v266_v39, %v283_v47  ;;  %v277_v50 = vsel %vm271_vm5, %v274_v41, %v276_v45 }
  0x88   : > { %v281_v51 = vsel %vm271_vm5, %v278_v43, %v280_v48  ;;  %v285_v52 = vsel %vm271_vm5, %v282_v44, %v284_v49  ;;  %v293_v57 = vmul.u32 %v286_v35, %v277_v50 }
  0x89   : > { %v1092_v53 = vmul.u32.u64.low %v286_v35, %v285_v52  ;;  %v1093_v54 = vmul.u32.u64.high %v286_v35, %v285_v52, %v1092_v53  ;;  %v1095_v55 = vmul.u32.u64.low %v286_v35, %v281_v51  ;;  %v1096_v56 = vmul.u32.u64.high %v286_v35, %v281_v51, %v1095_v55 }
  0x8b   : > { %vm295_vm7 = vc.u32 %v1093_v54, %v1095_v55  ;;  %v296_v58 = vadd.s32 1, %v1096_v56  ;;  %v294_v6 = vadd.s32 %v1095_v55, %v1093_v54 }
  0x8d   : > { %v297_v59 = vsel %vm295_vm7, %v296_v58, %v1096_v56 }
  0x8e   : > { %v298_v60 = vadd.s32 %v297_v59, %v293_v57 }
  0x90   : > { %v299_v61 = vadd.s32 536870912, %v298_v60 }
  0x92   : > { %v300_v62 = vshrl.u32 %v299_v61, 30 }
  0x94   : > { %v301_v63 = vshll.u32 %v300_v62, 30  ;;  %v324_v21 = vsub.s32 4, %v300_v62 }
  0x96   : > { %v302_v0 = vsub.s32 %v298_v60, %v301_v63  ;;  %v325_v24 = vsel %vm240_vm9, %v324_v21, %v300_v62 }
  0x97   : > { %v327_v25 = vsel %vm239_vm10, 0, %v325_v24 }
  0x98   : > { %v304_v1 = vsub.s32 0, %v302_v0  ;;  %v331_v26 = vand.u32 3, %v327_v25 }
  0x9a   : > { %v584_v2 = vmin.u32 %v304_v1, %v302_v0  ;;  %vm336_vm11 = vcmp.eq.s32.totalorder %v331_v26, 2  ;;  %vm333_vm12 = vcmp.eq.s32.totalorder %v331_v26, 0  ;;  %vm332_vm13 = vcmp.lt.s32.totalorder %v331_v26, 2 }
  0x9c   : > { %v306_v3 = vclz %v584_v2 }
  0x9e   : > { %v585_v4 = vadd.s32 4294967294, %v306_v3 }
  0xa0   : > { %vm586_vm8 = vcmp.lt.s32.totalorder %v585_v4, 0 }
  0xa1   : > { %v309_v7 = vsel %vm586_vm8, 0, %v585_v4 }
  0xa2   : > { %v310_v8 = vsub.s32 32, %v309_v7  ;;  %v311_v10 = vshll.u32 %v302_v0, %v309_v7  ;;  %v314_v11 = vsub.s32 4294967266, %v309_v7 }
  0xa4   : > { %v312_v12 = vshrl.u32 %v294_v6, %v310_v8  ;;  %v315_v13 = vadd.s32 127, %v314_v11 }
  0xa6   : > { %v313_v14 = vor.u32 %v312_v12, %v311_v10  ;;  %v316_v15 = vshll.u32 %v315_v13, 23 }
  0xa8   : > { %v317_v16 = vor.u32 4788187, %v316_v15  ;;  %v320_v17 = vcvt.s32.f32 %v313_v14 }
  0xaa   : > { %v318_v18 = vand.u32 2147483647, %v317_v16 }
  0xac   : > { %v321_v19 = vmul.f32 %v320_v17, %v318_v18 }
  0xae   : > { %v322_v20 = vxor.u32 2147483648, %v321_v19 }
  0xb0   : > { %v323_v22 = vsel %vm240_vm9, %v322_v20, %v321_v19 }
  0xb1   : > { %v326_v23 = vsel %vm239_vm10, %v1086_v5, %v323_v22 }
  0xb2   : > { %692 = vcosq.f32 %v326_v23 }
  0xb3   : > { %694 = vsinq.f32 %v326_v23 }
  0xbc   : > { %v693_v27 = vpop.eup %692 }
  0xbd   : > { %v695_v28 = vpop.eup %694  ;;  %v337_v29 = vxor.u32 2147483648, %v693_v27 }
  0xbe   : > { %v334_v30 = vxor.u32 2147483648, %v695_v28 }
  0xbf   : > { %v338_v9 = vsel %vm336_vm11, %v337_v29, %v695_v28 }
  0xc0   : > { %v335_v32 = vsel %vm333_vm12, %v693_v27, %v334_v30 }
  0xc1   : > { %v339_v33 = vsel %vm332_vm13, %v335_v32, %v338_v9 }
  0xc2   : > { %v340_v34 = vsel %vm330_vm14, nan, %v339_v33 }
  0xc3   : > { %v341_v35 = vmul.f32 %v340_v34, %v236_v31 }
  0xc5   : > { %603 = vmatmul.mubr.msk.f32.vlgmr.msra.gmra.mrb[0].mxu0 %vm345_vm15, %v341_v35 }
 0x198   : > { %v419_v36 = vpop.f32.mrb[0].mxu0 }
 0x199   : > { %v604_v37 = vpop.f32.mrb[1].mxu0  ;;  %v434_v38 = vrot.slane %v419_v36, 3  ;;  %v424_v39 = vrot.slane %v419_v36, 1  ;;  %v439_v40 = vrot.slane %v419_v36, 4  ;;  %v429_v41 = vrot.slane %v419_v36, 2 }
 0x19a   : > { %v449_v5 = vrot.slane %v419_v36, 6  ;;  %v444_v42 = vrot.slane %v419_v36, 5  ;;  %v454_v43 = vrot.slane %v419_v36, 7 }
 0x19b   : > { %436 = vrot.lane.b32.xlu1 %v434_v38, %s874_s18  ;;  %426 = vrot.lane.b32.xlu0 %v424_v39, %s875_s11 }
 0x19f   : > { %441 = vrot.lane.b32.xlu1 %v439_v40, %s876_s23  ;;  %431 = vrot.lane.b32.xlu0 %v429_v41, %s877_s27 }
 0x1a3   : > { %451 = vrot.lane.b32.xlu1 %v449_v5, %s878_s28  ;;  %446 = vrot.lane.b32.xlu0 %v444_v42, %s879_s5 }
 0x1a7   : > { %456 = vrot.lane.b32.xlu0 %v454_v43, %s880_s6 }
 0x20d   : > { %v437_v44 = vpop.permute.xlu1 %436  ;;  %v427_v45 = vpop.permute.xlu0 %426 }
 0x20e   : > { %v428_v46 = vadd.f32 %v427_v45, %v419_v36 }
 0x211   : > { %v432_v47 = vpop.permute.xlu0 %431  ;;  %v442_v49 = vpop.permute.xlu1 %441 }
 0x212   : > { %v433_v48 = vadd.f32 %v432_v47, %v428_v46 }
 0x214   : > { %v438_v50 = vadd.f32 %v437_v44, %v433_v48 }
 0x215   : > { %v447_v51 = vpop.permute.xlu0 %446  ;;  %v452_v54 = vpop.permute.xlu1 %451 }
 0x216   : > { %v443_v52 = vadd.f32 %v442_v49, %v438_v50 }
 0x218   : > { %v448_v53 = vadd.f32 %v447_v51, %v443_v52 }
 0x219   : > { %v457_v56 = vpop.permute.xlu0 %456 }
 0x21a   : > { %v453_v55 = vadd.f32 %v452_v54, %v448_v53 }
 0x21c   : > { %v458_v57 = vadd.f32 %v457_v56, %v453_v55 }
 0x21e   : > { %459 = vst [vmem:[%s235_s22] sm:$0x1] %v458_v57 }
 0x21f   : > { %797 = shalt.err (!%p794_p1)
}
 0x220   : > { %s798_s9 = scalar_lea.hbm %s1113_s30, 16  ;;  %s802_s23 = scalar_lea.hbm %s1160_s3, 32 }
 0x221   : > { %p799_p6 = scmp.ne.s32.totalorder %s1113_s30, %s798_s9  ;;  %p803_p12 = scmp.lt.u32.totalorder %s1113_s30, %s1160_s3 }
 0x222   : > { %p804_p11 = scmp.lt.u32.totalorder %s802_s23, %s798_s9  ;;  %p806_p10 = scmp.lt.u32.totalorder %s798_s9, %s1113_s30 }
 0x223   : > { %p800_p8 = pnand %p799_p6, %p1176_p13 }
 0x224   : > { %p805_p0 = por %p804_p11, %p803_p12 }
 0x225   : > { %p801_p4 = pneg %p800_p8 }
 0x226   : > { %p807_p3 = por %p806_p10, %p805_p0 }
 0x228   : > { %p808_p7 = pnand %p807_p3, %p801_p4 }
 0x22a   : > { %811 = shalt.err (!%p808_p7)
}
 0x22b   : > { %620 = dma.vmem_to_hbm [thread:$0]  (%p1176_p13), %s1115_s26, 16, %s1113_s30, %s461_s25  }
 0x22c PF: > { %s485_s5 = sand.u32 1, %s846_s12   ;;  %p1177_p9 = scmp.ne.s32.totalorder %s1166_s19, 0 }
 0x22d   : > { %p1178_p2 = scmp.ge.s32.totalorder %s858_s15, 2  ;;  %s486_s6 = scalar_lea.sflag [#allocation4], %s485_s5 }
 0x22f   : > { %p634_p5 = pnand %p1178_p2, %p1177_p9 }
 0x231   : > { %841 = dma.done.wait (!%p634_p5), %s486_s6, 16  }
 0x232   : > { %843 = vsyncadd (!%p634_p5), %s486_s6, 4294967280  ;;  %p19_p1 = scmp.ge.s32.totalorder %s958_s24, 4   ;;  %s1179_s12 = smov %s850_s13 }
 0x233   : > { %s1180_s13 = smov %s854_s14  ;;  %s1181_s14 = smov %s989_s17 }
 0x234   : > { %s1182_s15 = smov %s958_s24  ;;  %21 = sbr.rel (!%p19_p1) target bundleno = 7 (0x7), region = 94 }
 0x23b   :  { %490 = vsyncpa [#allocation3], 1 }
 0x23c   :  { %492 = vsyncpa [#allocation3 + $0x1], 1 }
 0x23d   :  { %493 = vsyncpa [#allocation6], 1 }
 0x23e   :  { %495 = vsyncpa [#allocation6 + $0x1], 1 }
 0x23f   :  { %496 = vsyncpa [#allocation4], 1 }
 0x240   :  { %498 = vsyncpa [#allocation4 + $0x1], 1 }

</bundles_post_ra>
